<compile_context>
chip_gen: v7x
topology: tpu7x:2x2x1
jax: 0.10.0
libtpu: 0.0.40
codegen_flags: <defaults>
</compile_context>

<pallas_src>
import functools

import jax
import jax.numpy as jnp
from jax.experimental import pallas as pl
from jax.experimental.pallas import tpu as pltpu


def _round_up(x, m):
    return (x + m - 1) // m * m


def actor_kernel(x_ref, w_ref, b_ref, o_ref):
    """One batch tile through the whole 4-layer MLP.

    x_ref : (tile, P)      compute dtype (bf16 or f32)
    w_ref : (4, P, P)      compute dtype, zero-padded weights [W1, W2, W3, Wp]
    b_ref : (4, 1, P)      f32, zero-padded biases            [b1, b2, b3, bp]
    o_ref : (tile, P)      f32 output (only first n_actions columns are real)
    """
    cdt = w_ref.dtype

    # fc1 + ReLU  (MXU matmul, f32 accumulation; elementwise in f32)
    h = jnp.dot(x_ref[...], w_ref[0], preferred_element_type=jnp.float32)
    h = jnp.maximum(h + b_ref[0], 0.0)
    # fc2 + ReLU
    h = jnp.dot(h.astype(cdt), w_ref[1], preferred_element_type=jnp.float32)
    h = jnp.maximum(h + b_ref[1], 0.0)
    # fc3 + ReLU
    h = jnp.dot(h.astype(cdt), w_ref[2], preferred_element_type=jnp.float32)
    h = jnp.maximum(h + b_ref[2], 0.0)
    # pi head + tanh (tanh runs on the EUP, off the VALU critical path)
    p = jnp.dot(h.astype(cdt), w_ref[3], preferred_element_type=jnp.float32)
    o_ref[...] = jnp.tanh(p + b_ref[3]).astype(o_ref.dtype)


def _pack_params(params, P, compute_dtype):
    """Zero-pad each weight to (P, P) / bias to (1, P) and stack into slabs."""
    w1, b1, w2, b2, w3, b3, wp, bp = params

    def pad_w(w):
        buf = jnp.zeros((P, P), compute_dtype)
        return buf.at[: w.shape[0], : w.shape[1]].set(w.astype(compute_dtype))

    def pad_b(b):
        buf = jnp.zeros((1, P), jnp.float32)
        return buf.at[:, : b.shape[1]].set(b.astype(jnp.float32))

    w_slab = jnp.stack([pad_w(w1), pad_w(w2), pad_w(w3), pad_w(wp)])   # (4, P, P)
    b_slab = jnp.stack([pad_b(b1), pad_b(b2), pad_b(b3), pad_b(bp)])   # (4, 1, P)
    return w_slab, b_slab


@functools.partial(jax.jit, static_argnames=("batch_tile", "compute_dtype"))
def actor_forward(state, params, *, batch_tile=256, compute_dtype=jnp.bfloat16):
    """state: (B, input_dims) float32 -> (B, n_actions) float32."""
    w1, b1, w2, b2, w3, b3, wp, bp = params
    B, d_in = state.shape
    n_actions = wp.shape[1]

    # Lane-dense padded feature width (all layers share it so the constant
    # weights pack into one uniform slab).
    dims = (d_in, w1.shape[1], w2.shape[1], w3.shape[1], n_actions)
    P = max(128, _round_up(max(dims), 128))

    # Batch tiling: multiple of 8 sublanes, shrink for tiny batches, pad B up.
    assert batch_tile % 8 == 0, "batch_tile must be a multiple of 8"
    tile = min(batch_tile, max(8, _round_up(B, 8)))
    B_pad = _round_up(B, tile)
    grid = (B_pad // tile,)

    # Pad + cast the state once in the wrapper (halves input DMA bytes when
    # compute_dtype is bf16).
    x = jnp.zeros((B_pad, P), compute_dtype)
    x = x.at[:B, :d_in].set(state.astype(compute_dtype))

    w_slab, b_slab = _pack_params(params, P, compute_dtype)

    # Explicit VMEM budget (double-buffered tiles + constant slabs + live f32
    # activations), with 4x headroom; always far below 64 MiB at these sizes.
    cd_bytes = jnp.dtype(compute_dtype).itemsize
    vmem_est = (2 * tile * P * cd_bytes          # state tiles (2 buffers)
                + 2 * tile * P * 4               # output tiles (2 buffers)
                + 2 * 4 * P * P * cd_bytes       # weight slab
                + 2 * 4 * P * 4                  # bias slab
                + 4 * tile * P * 4)              # live f32 activations
    vmem_limit = int(min(48 * 1024 * 1024, max(4 * vmem_est, 4 * 1024 * 1024)))

    out = pl.pallas_call(
        actor_kernel,
        out_shape=jax.ShapeDtypeStruct((B_pad, P), jnp.float32),
        grid_spec=pltpu.PrefetchScalarGridSpec(
            num_scalar_prefetch=0,
            grid=grid,
            in_specs=[
                pl.BlockSpec((tile, P), lambda i: (i, 0)),      # state tile
                pl.BlockSpec((4, P, P), lambda i: (0, 0, 0)),   # packed weights
                pl.BlockSpec((4, 1, P), lambda i: (0, 0, 0)),   # packed biases
            ],
            out_specs=pl.BlockSpec((tile, P), lambda i: (i, 0)),
        ),
        compiler_params=pltpu.CompilerParams(
            dimension_semantics=("parallel",),
            vmem_limit_bytes=vmem_limit,
        ),
    )(x, w_slab, b_slab)

    # Strip batch padding and the padded action lanes.
    return out[:B, :n_actions]


def init_actor_params(key, input_dims, fc1_dims, fc2_dims, fc3_dims, n_actions):
    """Parameter init mirroring the module: kaiming_normal_(relu) for fc1-3
    weights, PyTorch-default uniform for the pi head and all biases.
    Weights stored transposed: (in_features, out_features)."""
    keys = jax.random.split(key, 8)

    def kaiming_w(k, fan_in, fan_out):
        std = jnp.sqrt(2.0 / fan_in)
        return (std * jax.random.normal(k, (fan_in, fan_out))).astype(jnp.float32)

    def uniform_w(k, fan_in, fan_out):
        bound = 1.0 / jnp.sqrt(float(fan_in))
        return jax.random.uniform(k, (fan_in, fan_out), minval=-bound,
                                  maxval=bound).astype(jnp.float32)

    def bias(k, fan_in, fan_out):
        bound = 1.0 / jnp.sqrt(float(fan_in))
        return jax.random.uniform(k, (1, fan_out), minval=-bound,
                                  maxval=bound).astype(jnp.float32)

    w1 = kaiming_w(keys[0], input_dims, fc1_dims)
    b1 = bias(keys[1], input_dims, fc1_dims)
    w2 = kaiming_w(keys[2], fc1_dims, fc2_dims)
    b2 = bias(keys[3], fc1_dims, fc2_dims)
    w3 = kaiming_w(keys[4], fc2_dims, fc3_dims)
    b3 = bias(keys[5], fc2_dims, fc3_dims)
    wp = uniform_w(keys[6], fc3_dims, n_actions)
    bp = bias(keys[7], fc3_dims, n_actions)
    return (w1, b1, w2, b2, w3, b3, wp, bp)


def actor_forward_ref(state, params):
    """Pure-JAX f32 reference for correctness checking."""
    w1, b1, w2, b2, w3, b3, wp, bp = params
    h = jnp.maximum(state @ w1 + b1, 0.0)
    h = jnp.maximum(h @ w2 + b2, 0.0)
    h = jnp.maximum(h @ w3 + b3, 0.0)
    return jnp.tanh(h @ wp + bp)


# TODO(synk): optimizer/checkpoint-IO parts of the module (Adam, save/load)
# are training-host concerns with no Pallas-kernel equivalent; only the
# forward pass is implemented here.


if __name__ == "__main__":
    # Small shapes consistent with the module's forward:
    #   state: (batch, input_dims) -> pi: (batch, n_actions)
    batch = 96              # padded to 128 -> 2 "parallel" grid steps of 64
    input_dims = 16
    fc1_dims, fc2_dims, fc3_dims = 64, 64, 64
    n_actions = 8

    key = jax.random.PRNGKey(0)
    k_state, k_params = jax.random.split(key)

    state = jax.random.normal(k_state, (batch, input_dims), dtype=jnp.float32)
    params = init_actor_params(k_params, input_dims, fc1_dims, fc2_dims,
                               fc3_dims, n_actions)

    pi_ref = actor_forward_ref(state, params)

    # Fast path: bf16 matmul operands, f32 accumulation/elementwise.
    pi = actor_forward(state, params, batch_tile=64,
                       compute_dtype=jnp.bfloat16)
    pi = jax.block_until_ready(pi)
    assert pi.shape == (batch, n_actions)
    assert jnp.allclose(pi, pi_ref, atol=5e-2, rtol=5e-2), "bf16 path mismatch"

    # Exact-semantics check: same kernel with f32 compute.
    pi_f32 = actor_forward(state, params, batch_tile=64,
                           compute_dtype=jnp.float32)
    pi_f32 = jax.block_until_ready(pi_f32)
    assert jnp.allclose(pi_f32, pi_ref, atol=1e-5, rtol=1e-5), "f32 path mismatch"

    print("KERNEL_OK")
</pallas_src>

<mosaic_0001>
module attributes {stable_mosaic.version = 11 : i64} {
  func.func @actor_kernel(%arg0: i32, %arg1: memref<64x128xbf16, #tpu.memory_space<vmem>>, %arg2: memref<4x128x128xbf16, #tpu.memory_space<vmem>>, %arg3: memref<4x1x128xf32, #tpu.memory_space<vmem>>, %arg4: memref<64x128xf32, #tpu.memory_space<vmem>>) attributes {dimension_semantics = [#tpu.dimension_semantics<parallel>], iteration_bounds = array<i64: 2>, scalar_prefetch = 0 : i64, scratch_operands = 0 : i64, tpu.core_type = #tpu.core_type<tc>, window_params = [{transform_indices = @transform_0, window_bounds = array<i64: 64, 128>}, {pipeline_mode = #tpu.pipeline_mode<synchronous>, transform_indices = @transform_1, window_bounds = array<i64: 4, 128, 128>}, {pipeline_mode = #tpu.pipeline_mode<synchronous>, transform_indices = @transform_2, window_bounds = array<i64: 4, 1, 128>}, {transform_indices = @transform_3, window_bounds = array<i64: 64, 128>}]} {
    %c0 = arith.constant 0 : index
    %c0_0 = arith.constant 0 : index
    %0 = vector.load %arg1[%c0, %c0_0] : memref<64x128xbf16, #tpu.memory_space<vmem>>, vector<64x128xbf16>
    %c0_1 = arith.constant 0 : index
    %c0_2 = arith.constant 0 : index
    %c0_3 = arith.constant 0 : index
    %1 = vector.load %arg2[%c0_1, %c0_2, %c0_3] : memref<4x128x128xbf16, #tpu.memory_space<vmem>>, vector<1x128x128xbf16>
    %2 = vector.shape_cast %1 : vector<1x128x128xbf16> to vector<128x128xbf16>
    %cst = arith.constant dense<0.000000e+00> : vector<64x128xf32>
    %3 = tpu.matmul %0, %2, %cst {dimension_numbers = #tpu.dot_dimension_numbers<[1], [0], [0], [1], [0, 0, 1, 1], [], []>} : vector<64x128xbf16>, vector<128x128xbf16>, vector<64x128xf32> -> vector<64x128xf32>
    %c0_4 = arith.constant 0 : index
    %c0_5 = arith.constant 0 : index
    %c0_6 = arith.constant 0 : index
    %4 = vector.load %arg3[%c0_4, %c0_5, %c0_6] : memref<4x1x128xf32, #tpu.memory_space<vmem>>, vector<1x1x128xf32>
    %5 = vector.shape_cast %4 : vector<1x1x128xf32> to vector<1x128xf32>
    %6 = vector.broadcast %5 : vector<1x128xf32> to vector<64x128xf32>
    %7 = arith.addf %3, %6 : vector<64x128xf32>
    %cst_7 = arith.constant 0.000000e+00 : f32
    %8 = vector.broadcast %cst_7 : f32 to vector<64x128xf32>
    %9 = arith.maximumf %7, %8 : vector<64x128xf32>
    %10 = arith.truncf %9 : vector<64x128xf32> to vector<64x128xbf16>
    %c1 = arith.constant 1 : index
    %c0_8 = arith.constant 0 : index
    %c0_9 = arith.constant 0 : index
    %11 = vector.load %arg2[%c1, %c0_8, %c0_9] : memref<4x128x128xbf16, #tpu.memory_space<vmem>>, vector<1x128x128xbf16>
    %12 = vector.shape_cast %11 : vector<1x128x128xbf16> to vector<128x128xbf16>
    %cst_10 = arith.constant dense<0.000000e+00> : vector<64x128xf32>
    %13 = tpu.matmul %10, %12, %cst_10 {dimension_numbers = #tpu.dot_dimension_numbers<[1], [0], [0], [1], [0, 0, 1, 1], [], []>} : vector<64x128xbf16>, vector<128x128xbf16>, vector<64x128xf32> -> vector<64x128xf32>
    %c1_11 = arith.constant 1 : index
    %c0_12 = arith.constant 0 : index
    %c0_13 = arith.constant 0 : index
    %14 = vector.load %arg3[%c1_11, %c0_12, %c0_13] : memref<4x1x128xf32, #tpu.memory_space<vmem>>, vector<1x1x128xf32>
    %15 = vector.shape_cast %14 : vector<1x1x128xf32> to vector<1x128xf32>
    %16 = vector.broadcast %15 : vector<1x128xf32> to vector<64x128xf32>
    %17 = arith.addf %13, %16 : vector<64x128xf32>
    %cst_14 = arith.constant 0.000000e+00 : f32
    %18 = vector.broadcast %cst_14 : f32 to vector<64x128xf32>
    %19 = arith.maximumf %17, %18 : vector<64x128xf32>
    %20 = arith.truncf %19 : vector<64x128xf32> to vector<64x128xbf16>
    %c2 = arith.constant 2 : index
    %c0_15 = arith.constant 0 : index
    %c0_16 = arith.constant 0 : index
    %21 = vector.load %arg2[%c2, %c0_15, %c0_16] : memref<4x128x128xbf16, #tpu.memory_space<vmem>>, vector<1x128x128xbf16>
    %22 = vector.shape_cast %21 : vector<1x128x128xbf16> to vector<128x128xbf16>
    %cst_17 = arith.constant dense<0.000000e+00> : vector<64x128xf32>
    %23 = tpu.matmul %20, %22, %cst_17 {dimension_numbers = #tpu.dot_dimension_numbers<[1], [0], [0], [1], [0, 0, 1, 1], [], []>} : vector<64x128xbf16>, vector<128x128xbf16>, vector<64x128xf32> -> vector<64x128xf32>
    %c2_18 = arith.constant 2 : index
    %c0_19 = arith.constant 0 : index
    %c0_20 = arith.constant 0 : index
    %24 = vector.load %arg3[%c2_18, %c0_19, %c0_20] : memref<4x1x128xf32, #tpu.memory_space<vmem>>, vector<1x1x128xf32>
    %25 = vector.shape_cast %24 : vector<1x1x128xf32> to vector<1x128xf32>
    %26 = vector.broadcast %25 : vector<1x128xf32> to vector<64x128xf32>
    %27 = arith.addf %23, %26 : vector<64x128xf32>
    %cst_21 = arith.constant 0.000000e+00 : f32
    %28 = vector.broadcast %cst_21 : f32 to vector<64x128xf32>
    %29 = arith.maximumf %27, %28 : vector<64x128xf32>
    %30 = arith.truncf %29 : vector<64x128xf32> to vector<64x128xbf16>
    %c3 = arith.constant 3 : index
    %c0_22 = arith.constant 0 : index
    %c0_23 = arith.constant 0 : index
    %31 = vector.load %arg2[%c3, %c0_22, %c0_23] : memref<4x128x128xbf16, #tpu.memory_space<vmem>>, vector<1x128x128xbf16>
    %32 = vector.shape_cast %31 : vector<1x128x128xbf16> to vector<128x128xbf16>
    %cst_24 = arith.constant dense<0.000000e+00> : vector<64x128xf32>
    %33 = tpu.matmul %30, %32, %cst_24 {dimension_numbers = #tpu.dot_dimension_numbers<[1], [0], [0], [1], [0, 0, 1, 1], [], []>} : vector<64x128xbf16>, vector<128x128xbf16>, vector<64x128xf32> -> vector<64x128xf32>
    %c3_25 = arith.constant 3 : index
    %c0_26 = arith.constant 0 : index
    %c0_27 = arith.constant 0 : index
    %34 = vector.load %arg3[%c3_25, %c0_26, %c0_27] : memref<4x1x128xf32, #tpu.memory_space<vmem>>, vector<1x1x128xf32>
    %35 = vector.shape_cast %34 : vector<1x1x128xf32> to vector<1x128xf32>
    %36 = vector.broadcast %35 : vector<1x128xf32> to vector<64x128xf32>
    %37 = arith.addf %33, %36 : vector<64x128xf32>
    %38 = math.tanh %37 : vector<64x128xf32>
    %c0_28 = arith.constant 0 : index
    %c0_29 = arith.constant 0 : index
    %39 = vector.load %arg4[%c0_28, %c0_29] : memref<64x128xf32, #tpu.memory_space<vmem>>, vector<64x128xf32>
    tpu.vector_store %arg4[%c0_28, %c0_29], %38 {strides = array<i32>} : memref<64x128xf32, #tpu.memory_space<vmem>>, vector<64x128xf32>,
    return
  }
  func.func @transform_0(%arg0: i32) -> (i32, i32) {
    %c0_i32 = arith.constant 0 : i32
    %c0_i32_0 = arith.constant 0 : i32
    return %arg0, %c0_i32 : i32, i32
  }
  func.func @transform_1(%arg0: i32) -> (i32, i32, i32) {
    %c0_i32 = arith.constant 0 : i32
    %c0_i32_0 = arith.constant 0 : i32
    %c0_i32_1 = arith.constant 0 : i32
    %c0_i32_2 = arith.constant 0 : i32
    return %c0_i32, %c0_i32_0, %c0_i32_1 : i32, i32, i32
  }
  func.func @transform_2(%arg0: i32) -> (i32, i32, i32) {
    %c0_i32 = arith.constant 0 : i32
    %c0_i32_0 = arith.constant 0 : i32
    %c0_i32_1 = arith.constant 0 : i32
    %c0_i32_2 = arith.constant 0 : i32
    return %c0_i32, %c0_i32_0, %c0_i32_1 : i32, i32, i32
  }
  func.func @transform_3(%arg0: i32) -> (i32, i32) {
    %c0_i32 = arith.constant 0 : i32
    %c0_i32_0 = arith.constant 0 : i32
    return %arg0, %c0_i32 : i32, i32
  }
}

</mosaic_0001>

<bundles_post_ra>
// kernel: actor_forward.1
= control target key start
LH: loop header
LB: loop body
LE: loop exit
PB: predicated region body
PF: predicated region fallthrough
CT: control target
= control target key end

     0   :  { %s1199_s12 = smov 0   ;;  %s1334_s0 = inlined_call_operand.vmem [shape: bf16[128,128], index: 0, kind: input, shape index: {}]   ;;  %s1335_s1 = inlined_call_operand.vmem [shape: bf16[4,128,128], index: 1, kind: input, shape index: {}]   ;;  %s1336_s2 = inlined_call_operand.vmem [shape: f32[4,1,128], index: 2, kind: input, shape index: {}]   ;;  %s1337_s3 = inlined_call_operand.vmem [shape: f32[128,128], index: 3, kind: output, shape index: {}]  }
   0x1 LB: > { %s865_s13 = sadd.s32 4294967295, %s1177_s12   ;;  %p869_p0 = scmp.ge.s32.totalorder %s1177_s12, 1  ;;  %s1177_s12 = sphi %s1199_s12, %s13_s12  }
   0x2   : > { %p138_p1 = scmp.lt.s32.totalorder %s1177_s12, 3 }
   0x4   : > { %p139_p2 = pnand %p869_p0, %p138_p1 }
   0x5   : > { %v1119_v0 = vld [vmem:[%s1335_s1] sm:$0xff] (!%p139_p2)   ;;  %s870_s16 = sshll.u32 (!%p139_p2), %s865_s13, 3  ;;  %v1120_v1 = vld [vmem:[%s1335_s1 + $0x8] sm:$0xff] (!%p139_p2)   ;;  %v1121_v2 = vld [vmem:[%s1335_s1 + $0x10] sm:$0xff] (!%p139_p2)  }
   0x6   : > { %142 = sbr.rel (%p139_p2) target bundleno = 941 (0x3ad), region = 32  ;;  %p163_p3 = scmp.lt.s32.totalorder (!%p139_p2), %s870_s16, 15  ;;  %1015 = vmatprep.subr.bf16.mxu0 (!%p139_p2), %v1119_v0  ;;  %v1122_v3 = vld [vmem:[%s1335_s1 + $0x18] sm:$0xff] (!%p139_p2)   ;;  %v1123_v5 = vld [vmem:[%s1335_s1 + $0x20] sm:$0xff] (!%p139_p2)   ;;  %v1132_v7 = vld [vmem:[%s1335_s1 + $0x48] sm:$0xff] (!%p139_p2)  }
   0x7   : > { %1016 = vmatpush3.bf16.msra.mxu0 (!%p139_p2), %v1119_v0  ;;  %v1131_v6 = vld [vmem:[%s1335_s1 + $0x40] sm:$0xff] (!%p139_p2)   ;;  %v1124_v8 = vld [vmem:[%s1335_s1 + $0x28] sm:$0xff] (!%p139_p2)   ;;  %v1133_v9 = vld [vmem:[%s1335_s1 + $0x50] sm:$0xff] (!%p139_p2)  }
   0x8   : > { %1017 = vmatprep.subr.bf16.mxu0 (!%p139_p2), %v1120_v1  ;;  %1039 = vmatprep.subr.bf16.mxu1 (!%p139_p2), %v1131_v6  ;;  %v1125_v10 = vld [vmem:[%s1335_s1 + $0x30] sm:$0xff] (!%p139_p2)   ;;  %v1134_v11 = vld [vmem:[%s1335_s1 + $0x58] sm:$0xff] (!%p139_p2)   ;;  %v1135_v13 = vld [vmem:[%s1335_s1 + $0x60] sm:$0xff] (!%p139_p2)  }
   0x9   : > { %1040 = vmatpush3.bf16.msra.mxu1 (!%p139_p2), %v1131_v6  ;;  %v1126_v12 = vld [vmem:[%s1335_s1 + $0x38] sm:$0xff] (!%p139_p2)   ;;  %v1136_v14 = vld [vmem:[%s1335_s1 + $0x68] sm:$0xff] (!%p139_p2)   ;;  %v1137_v18 = vld [vmem:[%s1335_s1 + $0x70] sm:$0xff] (!%p139_p2)  }
   0xa   : > { %1041 = vmatprep.subr.bf16.mxu1 (!%p139_p2), %v1132_v7  ;;  %v1138_v19 = vld [vmem:[%s1335_s1 + $0x78] sm:$0xff] (!%p139_p2)   ;;  %v1139_v20 = vld [vmem:[%s1335_s1 + $0x80] sm:$0xff] (!%p139_p2)   ;;  %v1140_v21 = vld [vmem:[%s1335_s1 + $0x88] sm:$0xff] (!%p139_p2)  }
   0xb   : > { %1018 = vmatpush3.bf16.msra.mxu0 (!%p139_p2), %v1120_v1  ;;  %v1141_v22 = vld [vmem:[%s1335_s1 + $0x90] sm:$0xff] (!%p139_p2)   ;;  %v1142_v23 = vld [vmem:[%s1335_s1 + $0x98] sm:$0xff] (!%p139_p2)   ;;  %v1143_v24 = vld [vmem:[%s1335_s1 + $0xa0] sm:$0xff] (!%p139_p2)  }
   0xc   : > { %1019 = vmatprep.subr.bf16.mxu0 (!%p139_p2), %v1121_v2  ;;  %v1144_v25 = vld [vmem:[%s1335_s1 + $0xa8] sm:$0xff] (!%p139_p2)   ;;  %v874_v26 = vld [vmem:[%s1336_s2] ss:$0 sm:$0xff] (!%p139_p2)  ;;  %v1145_v55 = vld [vmem:[%s1335_s1 + $0xb0] sm:$0xff] (!%p139_p2)  }
   0xd   : > { %s1339_s16 = smov (!%p163_p3, %s870_s16), 15  ;;  %1042 = vmatpush3.bf16.msra.mxu1 %v1132_v7  ;;  %v1146_v56 = vld [vmem:[%s1335_s1 + $0xb8] sm:$0xff]   ;;  %v1147_v57 = vld [vmem:[%s1335_s1 + $0xc0] sm:$0xff]   ;;  %v1148_v58 = vld [vmem:[%s1335_s1 + $0xc8] sm:$0xff]  }
   0xe   : > { %s871_s21 = sshll.u32 %s1339_s16, 2  ;;  %1043 = vmatprep.subr.bf16.mxu1 %v1133_v9  ;;  %v1149_v59 = vld [vmem:[%s1335_s1 + $0xd0] sm:$0xff]   ;;  %v1150_v60 = vld [vmem:[%s1335_s1 + $0xd8] sm:$0xff]   ;;  %v1151_v61 = vld [vmem:[%s1335_s1 + $0xe0] sm:$0xff]   ;;  %s873_s15 = sshll.u32 %s1339_s16, 3 }
   0xf   : > { %s1222_s24 = scalar_lea.vmem %s1334_s0, %s871_s21  ;;  %1020 = vmatpush3.bf16.msra.mxu0 %v1121_v2  ;;  %v1152_v62 = vld [vmem:[%s1335_s1 + $0xe8] sm:$0xff]   ;;  %v904_v63 = vld [vmem:[%s1336_s2 + $0x1] ss:$0 sm:$0xff]  ;;  %s172_s19 = scalar_lea.vmem %s1337_s3, %s873_s15 }
  0x10   : > { %v1127_v4 = vld [vmem:[%s1222_s24] sm:$0xff]   ;;  %1021 = vmatprep.subr.bf16.mxu0 %v1122_v3  ;;  %v1128_v15 = vld [vmem:[%s1222_s24 + $0x8] sm:$0xff]   ;;  %v1129_v16 = vld [vmem:[%s1222_s24 + $0x10] sm:$0xff]  }
  0x11   : > { %1031 = vmatprep.mubr.bf16.mxu0 %v1127_v4  ;;  %1044 = vmatpush3.bf16.msra.mxu1 %v1133_v9  ;;  %v1130_v17 = vld [vmem:[%s1222_s24 + $0x18] sm:$0xff]  }
  0x12   : > { %1045 = vmatprep.subr.bf16.mxu1 %v1134_v11 }
  0x13   : > { %1022 = vmatpush3.bf16.msra.mxu0 %v1122_v3 }
  0x14   : > { %1023 = vmatprep.subr.bf16.mxu0 %v1123_v5 }
  0x15   : > { %1046 = vmatpush3.bf16.msra.mxu1 %v1134_v11 }
  0x16   : > { %1047 = vmatprep.subr.bf16.mxu1 %v1135_v13 }
  0x17   : > { %1024 = vmatpush3.bf16.msra.mxu0 %v1123_v5 }
  0x18   : > { %1025 = vmatprep.subr.bf16.mxu0 %v1124_v8 }
  0x19   : > { %1048 = vmatpush3.bf16.msra.mxu1 %v1135_v13 }
  0x1a   : > { %1049 = vmatprep.subr.bf16.mxu1 %v1136_v14 }
  0x1b   : > { %1026 = vmatpush3.bf16.msra.mxu0 %v1124_v8 }
  0x1c   : > { %1027 = vmatprep.subr.bf16.mxu0 %v1125_v10 }
  0x1d   : > { %1050 = vmatpush3.bf16.msra.mxu1 %v1136_v14 }
  0x1e   : > { %1051 = vmatprep.subr.bf16.mxu1 %v1137_v18 }
  0x1f   : > { %1028 = vmatpush3.bf16.msra.mxu0 %v1125_v10 }
  0x20   : > { %1029 = vmatprep.subr.bf16.mxu0 %v1126_v12 }
  0x21   : > { %1052 = vmatpush3.bf16.msra.mxu1 %v1137_v18 }
  0x22   : > { %1053 = vmatprep.subr.bf16.mxu1 %v1138_v19 }
  0x23   : > { %1030 = vmatpush3.bf16.msra.mxu0 %v1126_v12 }
  0x24   : > { %1063 = vmatprep.subr.bf16.mxu0 %v1139_v20 }
  0x25   : > { %1054 = vmatpush3.bf16.msra.mxu1 %v1138_v19 }
  0x26   : > { %1032 = vmatmul.mubr.bf16.vlgmr.msra.gmra.mrb[0].mxu0 %v1128_v15  ;;  %1087 = vmatprep.subr.bf16.mxu1 %v1147_v57 }
  0x27   : > { %1035 = vmatprep.mubr.bf16.mxu0 %v1129_v16  ;;  %1064 = vmatpush3.bf16.msra.mxu0 %v1139_v20 }
  0x28   : > { %1065 = vmatprep.subr.bf16.mxu0 %v1140_v21 }
  0x2b   : > { %1066 = vmatpush3.bf16.msra.mxu0 %v1140_v21 }
  0x2c   : > { %1067 = vmatprep.subr.bf16.mxu0 %v1141_v22 }
  0x2e   : > { %1036 = vmatmul.mubr.bf16.gmra.mrb[4].mxu0 %v1130_v17 }
  0x2f   : > { %1068 = vmatpush3.bf16.msra.mxu0 %v1141_v22 }
  0x30   : > { %1069 = vmatprep.subr.bf16.mxu0 %v1142_v23 }
  0x33   : > { %1070 = vmatpush3.bf16.msra.mxu0 %v1142_v23 }
  0x34   : > { %1071 = vmatprep.subr.bf16.mxu0 %v1143_v24 }
  0x37   : > { %1072 = vmatpush3.bf16.msra.mxu0 %v1143_v24 }
  0x38   : > { %1073 = vmatprep.subr.bf16.mxu0 %v1144_v25 }
  0x3b   : > { %1074 = vmatpush3.bf16.msra.mxu0 %v1144_v25 }
  0x3c   : > { %1075 = vmatprep.subr.bf16.mxu0 %v1145_v55 }
  0x3f   : > { %1076 = vmatpush3.bf16.msra.mxu0 %v1145_v55 }
  0x40   : > { %1077 = vmatprep.subr.bf16.mxu0 %v1146_v56 }
  0x43   : > { %1078 = vmatpush3.bf16.msra.mxu0 %v1146_v56 }
  0xf9   : > { %v1033_v27 = vpop.f32.mrb[0].mxu0 }
  0xfa   : > { %v321_v28 = vadd.f32 %v1033_v27, %v874_v26  ;;  %v312_v29 = vpop.f32.mrb[1].mxu0 }
  0xfb   : > { %v313_v30 = vadd.f32 %v874_v26, %v312_v29  ;;  %v1034_v31 = vpop.f32.mrb[2].mxu0  ;;  %v1154_v29 = vld [vmem:[%s1335_s1 + $0xf8] sm:$0xff]  }
  0xfc   : > { %v324_v32 = vadd.f32 %v1034_v31, %v874_v26  ;;  %v315_v33 = vpop.f32.mrb[3].mxu0  ;;  %v345_v35 = vmax.f32 %v321_v28, 0.0  ;;  %v1153_v28 = vld [vmem:[%s1335_s1 + $0xf0] sm:$0xff]  }
  0xfd   : > { %v316_v34 = vadd.f32 %v874_v26, %v315_v33  ;;  %v343_v37 = vmax.f32 %v313_v30, 0.0  ;;  %v930_v30 = vld [vmem:[%s1336_s2 + $0x2] ss:$0 sm:$0xff] }
  0xfe   : > { %v346_v36 = vmax.f32 %v324_v32, 0.0 }
  0xff   : > { %v344_v38 = vmax.f32 %v316_v34, 0.0 }
 0x100   : > { %v352_v39 = vpack.c.bf16 %v346_v36, %v345_v35 }
 0x101   : > { %v1037_v40 = vpop.f32.mrb[4].mxu0  ;;  %v351_v41 = vpack.c.bf16 %v344_v38, %v343_v37 }
 0x102   : > { %v337_v42 = vadd.f32 %v1037_v40, %v874_v26  ;;  %v328_v43 = vpop.f32.mrb[5].mxu0 }
 0x103   : > { %v329_v44 = vadd.f32 %v874_v26, %v328_v43  ;;  %v1038_v45 = vpop.f32.mrb[6].mxu0  ;;  %1055 = vmatprep.mubr.bf16.mxu1 %v351_v41 }
 0x104   : > { %v340_v46 = vadd.f32 %v1038_v45, %v874_v26  ;;  %v331_v47 = vpop.f32.mrb[7].mxu0  ;;  %1056 = vmatmul.mubr.bf16.vlgmr.msra.gmra.mrb[0].mxu1 %v352_v39  ;;  %v349_v49 = vmax.f32 %v337_v42, 0.0 }
 0x105   : > { %v332_v48 = vadd.f32 %v874_v26, %v331_v47  ;;  %v347_v51 = vmax.f32 %v329_v44, 0.0  ;;  %1088 = vmatpush3.bf16.msra.mxu1 %v1147_v57 }
 0x106   : > { %v350_v50 = vmax.f32 %v340_v46, 0.0  ;;  %1089 = vmatprep.subr.bf16.mxu1 %v1148_v58 }
 0x107   : > { %v348_v52 = vmax.f32 %v332_v48, 0.0 }
 0x108   : > { %v354_v53 = vpack.c.bf16 %v350_v50, %v349_v49 }
 0x109   : > { %v353_v54 = vpack.c.bf16 %v348_v52, %v347_v51  ;;  %1090 = vmatpush3.bf16.msra.mxu1 %v1148_v58 }
 0x10a   : > { %1091 = vmatprep.subr.bf16.mxu1 %v1149_v59 }
 0x10b   : > { %1059 = vmatprep.mubr.bf16.mxu1 %v353_v54 }
 0x10c   : > { %1060 = vmatmul.mubr.bf16.gmra.mrb[4].mxu1 %v354_v53 }
 0x10d   : > { %1092 = vmatpush3.bf16.msra.mxu1 %v1149_v59  ;;  %v956_v59 = vld [vmem:[%s1336_s2 + $0x3] ss:$0 sm:$0xff] }
 0x10e   : > { %1093 = vmatprep.subr.bf16.mxu1 %v1150_v60 }
 0x111   : > { %1094 = vmatpush3.bf16.msra.mxu1 %v1150_v60 }
 0x112   : > { %1095 = vmatprep.subr.bf16.mxu1 %v1151_v61 }
 0x115   : > { %1096 = vmatpush3.bf16.msra.mxu1 %v1151_v61 }
 0x116   : > { %1097 = vmatprep.subr.bf16.mxu1 %v1152_v62 }
 0x119   : > { %1098 = vmatpush3.bf16.msra.mxu1 %v1152_v62 }
 0x11a   : > { %1099 = vmatprep.subr.bf16.mxu1 %v1153_v28 }
 0x11d   : > { %1100 = vmatpush3.bf16.msra.mxu1 %v1153_v28 }
 0x11e   : > { %1101 = vmatprep.subr.bf16.mxu1 %v1154_v29 }
 0x121   : > { %1102 = vmatpush3.bf16.msra.mxu1 %v1154_v29 }
 0x1d7   : > { %v1057_v0 = vpop.f32.mrb[0].mxu1 }
 0x1d8   : > { %v471_v1 = vadd.f32 %v1057_v0, %v904_v63  ;;  %v462_v2 = vpop.f32.mrb[1].mxu1 }
 0x1d9   : > { %v463_v3 = vadd.f32 %v904_v63, %v462_v2  ;;  %v1058_v4 = vpop.f32.mrb[2].mxu1 }
 0x1da   : > { %v474_v5 = vadd.f32 %v1058_v4, %v904_v63  ;;  %v465_v6 = vpop.f32.mrb[3].mxu1  ;;  %v495_v8 = vmax.f32 %v471_v1, 0.0 }
 0x1db   : > { %v466_v7 = vadd.f32 %v904_v63, %v465_v6  ;;  %v493_v10 = vmax.f32 %v463_v3, 0.0 }
 0x1dc   : > { %v496_v9 = vmax.f32 %v474_v5, 0.0 }
 0x1dd   : > { %v494_v11 = vmax.f32 %v466_v7, 0.0 }
 0x1de   : > { %v502_v12 = vpack.c.bf16 %v496_v9, %v495_v8 }
 0x1df   : > { %v501_v13 = vpack.c.bf16 %v494_v11, %v493_v10  ;;  %v1061_v14 = vpop.f32.mrb[4].mxu1 }
 0x1e0   : > { %v487_v15 = vadd.f32 %v1061_v14, %v904_v63  ;;  %v478_v16 = vpop.f32.mrb[5].mxu1 }
 0x1e1   : > { %v479_v17 = vadd.f32 %v904_v63, %v478_v16  ;;  %v1062_v18 = vpop.f32.mrb[6].mxu1  ;;  %1079 = vmatprep.mubr.bf16.mxu0 %v501_v13 }
 0x1e2   : > { %v490_v19 = vadd.f32 %v1062_v18, %v904_v63  ;;  %v481_v20 = vpop.f32.mrb[7].mxu1  ;;  %1080 = vmatmul.mubr.bf16.vlgmr.msra.gmra.mrb[8].mxu0 %v502_v12  ;;  %v499_v22 = vmax.f32 %v487_v15, 0.0 }
 0x1e3   : > { %v482_v21 = vadd.f32 %v904_v63, %v481_v20  ;;  %v497_v24 = vmax.f32 %v479_v17, 0.0 }
 0x1e4   : > { %v500_v23 = vmax.f32 %v490_v19, 0.0 }
 0x1e5   : > { %v498_v25 = vmax.f32 %v482_v21, 0.0 }
 0x1e6   : > { %v504_v26 = vpack.c.bf16 %v500_v23, %v499_v22 }
 0x1e7   : > { %v503_v27 = vpack.c.bf16 %v498_v25, %v497_v24 }
 0x1e9   : > { %1083 = vmatprep.mubr.bf16.mxu0 %v503_v27 }
 0x1ea   : > { %1084 = vmatmul.mubr.bf16.gmra.mrb[12].mxu0 %v504_v26 }
 0x2b5   : > { %v1081_v31 = vpop.f32.mrb[8].mxu0 }
 0x2b6   : > { %v621_v32 = vadd.f32 %v1081_v31, %v930_v30  ;;  %v612_v33 = vpop.f32.mrb[9].mxu0 }
 0x2b7   : > { %v613_v34 = vadd.f32 %v930_v30, %v612_v33  ;;  %v1082_v35 = vpop.f32.mrb[10].mxu0 }
 0x2b8   : > { %v624_v36 = vadd.f32 %v1082_v35, %v930_v30  ;;  %v615_v37 = vpop.f32.mrb[11].mxu0  ;;  %v645_v39 = vmax.f32 %v621_v32, 0.0 }
 0x2b9   : > { %v616_v38 = vadd.f32 %v930_v30, %v615_v37  ;;  %v643_v41 = vmax.f32 %v613_v34, 0.0 }
 0x2ba   : > { %v646_v40 = vmax.f32 %v624_v36, 0.0 }
 0x2bb   : > { %v644_v42 = vmax.f32 %v616_v38, 0.0 }
 0x2bc   : > { %v652_v43 = vpack.c.bf16 %v646_v40, %v645_v39 }
 0x2bd   : > { %v651_v44 = vpack.c.bf16 %v644_v42, %v643_v41  ;;  %v1085_v45 = vpop.f32.mrb[12].mxu0 }
 0x2be   : > { %v637_v46 = vadd.f32 %v1085_v45, %v930_v30  ;;  %v628_v47 = vpop.f32.mrb[13].mxu0 }
 0x2bf   : > { %v629_v48 = vadd.f32 %v930_v30, %v628_v47  ;;  %v1086_v49 = vpop.f32.mrb[14].mxu0  ;;  %1103 = vmatprep.mubr.bf16.mxu1 %v651_v44 }
 0x2c0   : > { %v640_v50 = vadd.f32 %v1086_v49, %v930_v30  ;;  %v631_v51 = vpop.f32.mrb[15].mxu0  ;;  %1104 = vmatmul.mubr.bf16.vlgmr.msra.gmra.mrb[8].mxu1 %v652_v43  ;;  %v649_v53 = vmax.f32 %v637_v46, 0.0 }
 0x2c1   : > { %v632_v52 = vadd.f32 %v930_v30, %v631_v51  ;;  %v647_v55 = vmax.f32 %v629_v48, 0.0 }
 0x2c2   : > { %v650_v54 = vmax.f32 %v640_v50, 0.0 }
 0x2c3   : > { %v648_v56 = vmax.f32 %v632_v52, 0.0 }
 0x2c4   : > { %v654_v57 = vpack.c.bf16 %v650_v54, %v649_v53 }
 0x2c5   : > { %v653_v58 = vpack.c.bf16 %v648_v56, %v647_v55 }
 0x2c7   : > { %1107 = vmatprep.mubr.bf16.mxu1 %v653_v58 }
 0x2c8   : > { %1108 = vmatmul.mubr.bf16.gmra.mrb[12].mxu1 %v654_v57 }
 0x393   : > { %v1105_v60 = vpop.f32.mrb[8].mxu1 }
 0x394   : > { %v771_v61 = vadd.f32 %v1105_v60, %v956_v59  ;;  %v762_v62 = vpop.f32.mrb[9].mxu1 }
 0x395   : > { %v763_v63 = vadd.f32 %v956_v59, %v762_v62  ;;  %v1106_v0 = vpop.f32.mrb[10].mxu1 }
 0x396   : > { %1155 = vtanh.f32 %v771_v61  ;;  %v774_v1 = vadd.f32 %v1106_v0, %v956_v59  ;;  %v765_v2 = vpop.f32.mrb[11].mxu1 }
 0x397   : > { %1157 = vtanh.f32 %v763_v63  ;;  %v766_v3 = vadd.f32 %v956_v59, %v765_v2 }
 0x398   : > { %1159 = vtanh.f32 %v774_v1 }
 0x399   : > { %1161 = vtanh.f32 %v766_v3 }
 0x39b   : > { %v1109_v4 = vpop.f32.mrb[12].mxu1 }
 0x39c   : > { %v787_v5 = vadd.f32 %v1109_v4, %v956_v59  ;;  %v778_v6 = vpop.f32.mrb[13].mxu1 }
 0x39d   : > { %v779_v7 = vadd.f32 %v956_v59, %v778_v6  ;;  %v1110_v8 = vpop.f32.mrb[14].mxu1 }
 0x39e   : > { %1163 = vtanh.f32 %v787_v5  ;;  %v790_v9 = vadd.f32 %v1110_v8, %v956_v59  ;;  %v781_v10 = vpop.f32.mrb[15].mxu1 }
 0x39f   : > { %1165 = vtanh.f32 %v779_v7  ;;  %v782_v11 = vadd.f32 %v956_v59, %v781_v10 }
 0x3a0   : > { %v1156_v12 = vpop.eup %1155  ;;  %1167 = vtanh.f32 %v790_v9 }
 0x3a1   : > { %v1158_v13 = vpop.eup %1157  ;;  %803 = vst [vmem:[%s172_s19 + $0x10] sm:$0xff] %v1156_v12  ;;  %1169 = vtanh.f32 %v782_v11 }
 0x3a2   : > { %v1160_v14 = vpop.eup %1159  ;;  %801 = vst [vmem:[%s172_s19] sm:$0xff] %v1158_v13 }
 0x3a3   : > { %v1162_v15 = vpop.eup %1161  ;;  %804 = vst [vmem:[%s172_s19 + $0x18] sm:$0xff] %v1160_v14 }
 0x3a4   : > { %802 = vst [vmem:[%s172_s19 + $0x8] sm:$0xff] %v1162_v15 }
 0x3a8   : > { %v1164_v16 = vpop.eup %1163 }
 0x3a9   : > { %v1166_v17 = vpop.eup %1165  ;;  %807 = vst [vmem:[%s172_s19 + $0x30] sm:$0xff] %v1164_v16 }
 0x3aa   : > { %v1168_v18 = vpop.eup %1167  ;;  %805 = vst [vmem:[%s172_s19 + $0x20] sm:$0xff] %v1166_v17 }
 0x3ab   : > { %v1170_v19 = vpop.eup %1169  ;;  %808 = vst [vmem:[%s172_s19 + $0x38] sm:$0xff] %v1168_v18 }
 0x3ac   : > { %806 = vst [vmem:[%s172_s19 + $0x28] sm:$0xff] %v1170_v19 }
 0x3ad PF: > { %s13_s12 = sadd.s32 1, %s1177_s12  }
 0x3ae   : > { %p10_p4 = scmp.ge.s32.totalorder %s13_s12, 4  }
 0x3b0   :  { %12 = sbr.rel (!%p10_p4) target bundleno = 1 (0x1), region = 68 }

</bundles_post_ra>
